<compile_context>
chip_gen: v6e
topology: v6e:2x2x1
jax: 0.10.0
libtpu: 0.0.40
codegen_flags: <defaults>
</compile_context>

<pallas_src>
import functools
import math

import jax
import jax.numpy as jnp
from jax.experimental import pallas as pl
from jax.experimental.pallas import tpu as pltpu


_VMEM_TILE_BUDGET = 36 * 1024 * 1024   # conservative across v5e/v6e (128 MiB) and v7x (64 MiB)
_VMEM_LIMIT_CAP = 56 * 1024 * 1024


def _round_up(x, m):
    return (x + m - 1) // m * m


def _gate_attention_kernel(a_ref, b_ref, w1_ref, w2_ref, bias_ref, o_ref, *,
                           mm_dtype):
    a = a_ref[...]
    b = b_ref[...]
    # Two MXU matmuls (bf16 operands when mm_dtype is bf16), f32 accumulation.
    wa = jnp.dot(a.astype(mm_dtype), w1_ref[...],
                 preferred_element_type=jnp.float32)
    wb = jnp.dot(b.astype(mm_dtype), w2_ref[...],
                 preferred_element_type=jnp.float32)
    gate = jax.nn.sigmoid(wa + wb + bias_ref[...])    # bias broadcasts over rows
    a32 = a.astype(jnp.float32)
    b32 = b.astype(jnp.float32)
    o_ref[...] = (gate * a32 + (1.0 - gate) * b32).astype(o_ref.dtype)


def _choose_tm(M, row_bytes, weight_bytes, mult):
    """Largest row tile that fits the VMEM budget; prefer >= 2 grid steps."""
    avail = max(_VMEM_TILE_BUDGET - weight_bytes, row_bytes * mult)
    tm = max(mult, min(1024, avail // row_bytes))
    tm = (tm // mult) * mult
    if tm >= M:
        if M > mult:
            # At least 2 grid steps -> software pipelining + v7x megacore split.
            tm = _round_up(pl.cdiv(M, 2), mult)
        else:
            tm = _round_up(max(M, 1), mult)
    return int(tm)


def _make_call(M, Hp, tm, out_dtype, mm_dtype, vmem_limit, single_buffer_weights):
    kernel = functools.partial(_gate_attention_kernel, mm_dtype=mm_dtype)

    def wspec(shape):
        # Weights/bias never change across the grid; one buffer is enough.
        if single_buffer_weights:
            return pl.BlockSpec(shape, lambda i: (0, 0),
                                pipeline_mode=pl.Buffered(1))
        return pl.BlockSpec(shape, lambda i: (0, 0))

    return pl.pallas_call(
        kernel,
        out_shape=jax.ShapeDtypeStruct((M, Hp), out_dtype),
        grid_spec=pltpu.PrefetchScalarGridSpec(
            num_scalar_prefetch=0,
            grid=(pl.cdiv(M, tm),),
            in_specs=[
                pl.BlockSpec((tm, Hp), lambda i: (i, 0)),   # a rows (pipelined)
                pl.BlockSpec((tm, Hp), lambda i: (i, 0)),   # b rows (pipelined)
                wspec((Hp, Hp)),                            # w1 (resident)
                wspec((Hp, Hp)),                            # w2 (resident)
                wspec((1, Hp)),                             # bias (resident)
            ],
            out_specs=pl.BlockSpec((tm, Hp), lambda i: (i, 0)),
        ),
        compiler_params=pltpu.CompilerParams(
            dimension_semantics=("parallel",),
            vmem_limit_bytes=int(vmem_limit),
        ),
    )


def gate_attention(a, b, w1, w2, bias, *, tm=None, matmul_dtype=None):
    """a, b: [..., H]; w1, w2: [H, H]; bias: [H]. Returns [..., H]."""
    assert a.shape == b.shape, "a and b must have the same shape"
    H = w1.shape[1]
    assert w2.shape[1] == H and bias.shape[-1] == H
    # The gating blend requires num_hidden_a == num_hidden_b == num_hidden.
    assert a.shape[-1] == H and w1.shape[0] == H and w2.shape[0] == H, (
        "Gate_Attention blend requires num_hidden_a == num_hidden_b == num_hidden")

    lead = a.shape[:-1]
    a2 = a.reshape(-1, H)
    b2 = b.reshape(-1, H)
    M = a2.shape[0]

    in_dtype = a.dtype
    if matmul_dtype is None:
        # bf16 matmuls when activations are already half precision; keep f32
        # matmuls for f32 inputs to preserve the reference numerics.
        matmul_dtype = (jnp.bfloat16 if jnp.dtype(in_dtype).itemsize <= 2
                        else jnp.float32)
    matmul_dtype = jnp.dtype(matmul_dtype)

    # Lane-dense hidden dim (multiple of 128). Zero padding is exact for the
    # matmuls; padded output columns are sliced off below.
    Hp = _round_up(H, 128)
    if Hp != H:
        pad = Hp - H
        a2 = jnp.pad(a2, ((0, 0), (0, pad)))
        b2 = jnp.pad(b2, ((0, 0), (0, pad)))
        w1 = jnp.pad(w1, ((0, pad), (0, pad)))
        w2 = jnp.pad(w2, ((0, pad), (0, pad)))
        bias = jnp.pad(bias.reshape(-1), ((0, pad),))
    w1p = w1.astype(matmul_dtype)
    w2p = w2.astype(matmul_dtype)
    bias2 = bias.reshape(1, Hp).astype(jnp.float32)

    in_isz = jnp.dtype(in_dtype).itemsize
    w_isz = matmul_dtype.itemsize
    mult = 16 if in_isz <= 2 else 8          # sublane packing for 16-bit dtypes

    # VMEM accounting: resident single-buffered weights + f32 bias, plus
    # per-row bytes for double-buffered a/b/out streams and f32 intermediates.
    weight_bytes = 2 * Hp * Hp * w_isz + Hp * 4
    row_bytes = Hp * (4 * in_isz + 2 * in_isz + 24)
    if tm is None:
        tm = _choose_tm(M, row_bytes, weight_bytes, mult)
    else:
        tm = _round_up(int(tm), mult)
    vmem_need = weight_bytes + tm * row_bytes
    vmem_limit = min(vmem_need + (16 << 20), _VMEM_LIMIT_CAP)
    # TODO(synk): for very large H (resident weights >~ 24 MiB) add a second
    # grid axis over output columns instead of keeping w1/w2 fully resident.

    args = (a2, b2, w1p, w2p, bias2)
    try:
        out = _make_call(M, Hp, tm, in_dtype, matmul_dtype, vmem_limit,
                         single_buffer_weights=True)(*args)
    except Exception:
        # Some JAX builds may not accept single-buffered (pl.Buffered(1))
        # operands in the auto-pipeline; fall back to default double buffering.
        out = _make_call(M, Hp, tm, in_dtype, matmul_dtype, vmem_limit,
                         single_buffer_weights=False)(*args)

    if Hp != H:
        out = out[:, :H]
    return out.reshape(lead + (H,))


def init_params(key, num_hidden_a, num_hidden_b, num_hidden, dtype=jnp.float32):
    """Deterministic init mirroring reset_parameter() (uniform in +/- stdv)."""
    stdv1 = 1.0 / math.sqrt(num_hidden)
    stdv2 = 1.0 / math.sqrt(num_hidden)
    stdv = (stdv1 + stdv2) / 2.0
    k1, k2, k3 = jax.random.split(key, 3)
    w1 = jax.random.uniform(k1, (num_hidden_a, num_hidden), dtype,
                            minval=-stdv1, maxval=stdv1)
    w2 = jax.random.uniform(k2, (num_hidden_b, num_hidden), dtype,
                            minval=-stdv2, maxval=stdv2)
    bias = jax.random.uniform(k3, (num_hidden,), dtype,
                              minval=-stdv, maxval=stdv)
    return w1, w2, bias


def gate_attention_ref(a, b, w1, w2, bias):
    wa = jnp.matmul(a, w1)
    wb = jnp.matmul(b, w2)
    gate = jax.nn.sigmoid(wa + wb + bias)
    return gate * a + (1.0 - gate) * b


if __name__ == "__main__":
    key = jax.random.PRNGKey(0)
    ka, kb, kp, k2a, k2b, k2p = jax.random.split(key, 6)

    # --- Test 1: small f32 problem (H=32 -> lane-padded to 128 in wrapper,
    #     tm=8 -> 2 grid steps), f32 MXU path, tight tolerance. ---
    batch, seq, hidden = 2, 8, 32
    a = jax.random.normal(ka, (batch, seq, hidden), jnp.float32)
    b = jax.random.normal(kb, (batch, seq, hidden), jnp.float32)
    w1, w2, bias = init_params(kp, hidden, hidden, hidden)

    out = jax.block_until_ready(gate_attention(a, b, w1, w2, bias))
    ref = gate_attention_ref(a, b, w1, w2, bias)
    assert out.shape == ref.shape and out.dtype == ref.dtype
    assert jnp.allclose(out, ref, atol=1e-4, rtol=1e-4)

    # --- Test 2: bf16 activations, multi-tile grid (M=1024, tm=512 -> 2 steps),
    #     bf16 MXU matmuls with f32 accumulation. ---
    batch2, seq2, hidden2 = 4, 256, 128
    a2 = jax.random.normal(k2a, (batch2, seq2, hidden2), jnp.float32)
    b2 = jax.random.normal(k2b, (batch2, seq2, hidden2), jnp.float32)
    w1b, w2b, biasb = init_params(k2p, hidden2, hidden2, hidden2)
    a2h = a2.astype(jnp.bfloat16)
    b2h = b2.astype(jnp.bfloat16)

    out2 = jax.block_until_ready(gate_attention(a2h, b2h, w1b, w2b, biasb))
    ref2 = gate_attention_ref(a2h.astype(jnp.float32),
                              b2h.astype(jnp.float32), w1b, w2b, biasb)
    assert out2.shape == ref2.shape and out2.dtype == jnp.bfloat16
    assert jnp.allclose(out2.astype(jnp.float32), ref2, atol=1e-1, rtol=1e-1)

    print("KERNEL_OK")
</pallas_src>

<mosaic_0001>
module attributes {stable_mosaic.version = 11 : i64} {
  func.func @_gate_attention_kernel(%arg0: i32, %arg1: memref<8x128xf32, #tpu.memory_space<vmem>>, %arg2: memref<8x128xf32, #tpu.memory_space<vmem>>, %arg3: memref<128x128xf32, #tpu.memory_space<vmem>>, %arg4: memref<128x128xf32, #tpu.memory_space<vmem>>, %arg5: memref<1x128xf32, #tpu.memory_space<vmem>>, %arg6: memref<8x128xf32, #tpu.memory_space<vmem>>) attributes {dimension_semantics = [#tpu.dimension_semantics<parallel>], iteration_bounds = array<i64: 2>, scalar_prefetch = 0 : i64, scratch_operands = 0 : i64, tpu.core_type = #tpu.core_type<tc>, window_params = [{transform_indices = @transform_0, window_bounds = array<i64: 8, 128>}, {transform_indices = @transform_1, window_bounds = array<i64: 8, 128>}, {pipeline_mode = #tpu.pipeline_mode<synchronous>, transform_indices = @transform_2, window_bounds = array<i64: 128, 128>}, {pipeline_mode = #tpu.pipeline_mode<synchronous>, transform_indices = @transform_3, window_bounds = array<i64: 128, 128>}, {pipeline_mode = #tpu.pipeline_mode<synchronous>, transform_indices = @transform_4, window_bounds = array<i64: 1, 128>}, {transform_indices = @transform_5, window_bounds = array<i64: 8, 128>}]} {
    %c0 = arith.constant 0 : index
    %c0_0 = arith.constant 0 : index
    %0 = vector.load %arg1[%c0, %c0_0] : memref<8x128xf32, #tpu.memory_space<vmem>>, vector<8x128xf32>
    %c0_1 = arith.constant 0 : index
    %c0_2 = arith.constant 0 : index
    %1 = vector.load %arg2[%c0_1, %c0_2] : memref<8x128xf32, #tpu.memory_space<vmem>>, vector<8x128xf32>
    %c0_3 = arith.constant 0 : index
    %c0_4 = arith.constant 0 : index
    %2 = vector.load %arg3[%c0_3, %c0_4] : memref<128x128xf32, #tpu.memory_space<vmem>>, vector<128x128xf32>
    %cst = arith.constant dense<0.000000e+00> : vector<8x128xf32>
    %3 = tpu.matmul %0, %2, %cst {dimension_numbers = #tpu.dot_dimension_numbers<[1], [0], [0], [1], [0, 0, 1, 1], [], []>} : vector<8x128xf32>, vector<128x128xf32>, vector<8x128xf32> -> vector<8x128xf32>
    %c0_5 = arith.constant 0 : index
    %c0_6 = arith.constant 0 : index
    %4 = vector.load %arg4[%c0_5, %c0_6] : memref<128x128xf32, #tpu.memory_space<vmem>>, vector<128x128xf32>
    %cst_7 = arith.constant dense<0.000000e+00> : vector<8x128xf32>
    %5 = tpu.matmul %1, %4, %cst_7 {dimension_numbers = #tpu.dot_dimension_numbers<[1], [0], [0], [1], [0, 0, 1, 1], [], []>} : vector<8x128xf32>, vector<128x128xf32>, vector<8x128xf32> -> vector<8x128xf32>
    %6 = arith.addf %3, %5 : vector<8x128xf32>
    %c0_8 = arith.constant 0 : index
    %c0_9 = arith.constant 0 : index
    %7 = vector.load %arg5[%c0_8, %c0_9] : memref<1x128xf32, #tpu.memory_space<vmem>>, vector<1x128xf32>
    %8 = vector.broadcast %7 : vector<1x128xf32> to vector<8x128xf32>
    %9 = arith.addf %6, %8 : vector<8x128xf32>
    %10 = arith.negf %9 : vector<8x128xf32>
    %11 = math.exp %10 : vector<8x128xf32>
    %cst_10 = arith.constant 1.000000e+00 : f32
    %12 = vector.broadcast %cst_10 : f32 to vector<8x128xf32>
    %13 = arith.addf %12, %11 : vector<8x128xf32>
    %14 = arith.divf %12, %13 : vector<8x128xf32>
    %15 = arith.mulf %14, %0 : vector<8x128xf32>
    %cst_11 = arith.constant 1.000000e+00 : f32
    %16 = vector.broadcast %cst_11 : f32 to vector<8x128xf32>
    %17 = arith.subf %16, %14 : vector<8x128xf32>
    %18 = arith.mulf %17, %1 : vector<8x128xf32>
    %19 = arith.addf %15, %18 : vector<8x128xf32>
    %c0_12 = arith.constant 0 : index
    %c0_13 = arith.constant 0 : index
    %20 = vector.load %arg6[%c0_12, %c0_13] : memref<8x128xf32, #tpu.memory_space<vmem>>, vector<8x128xf32>
    tpu.vector_store %arg6[%c0_12, %c0_13], %19 {strides = array<i32>} : memref<8x128xf32, #tpu.memory_space<vmem>>, vector<8x128xf32>,
    return
  }
  func.func @transform_0(%arg0: i32) -> (i32, i32) {
    %c0_i32 = arith.constant 0 : i32
    %c0_i32_0 = arith.constant 0 : i32
    return %arg0, %c0_i32 : i32, i32
  }
  func.func @transform_1(%arg0: i32) -> (i32, i32) {
    %c0_i32 = arith.constant 0 : i32
    %c0_i32_0 = arith.constant 0 : i32
    return %arg0, %c0_i32 : i32, i32
  }
  func.func @transform_2(%arg0: i32) -> (i32, i32) {
    %c0_i32 = arith.constant 0 : i32
    %c0_i32_0 = arith.constant 0 : i32
    %c0_i32_1 = arith.constant 0 : i32
    return %c0_i32, %c0_i32_0 : i32, i32
  }
  func.func @transform_3(%arg0: i32) -> (i32, i32) {
    %c0_i32 = arith.constant 0 : i32
    %c0_i32_0 = arith.constant 0 : i32
    %c0_i32_1 = arith.constant 0 : i32
    return %c0_i32, %c0_i32_0 : i32, i32
  }
  func.func @transform_4(%arg0: i32) -> (i32, i32) {
    %c0_i32 = arith.constant 0 : i32
    %c0_i32_0 = arith.constant 0 : i32
    %c0_i32_1 = arith.constant 0 : i32
    return %c0_i32, %c0_i32_0 : i32, i32
  }
  func.func @transform_5(%arg0: i32) -> (i32, i32) {
    %c0_i32 = arith.constant 0 : i32
    %c0_i32_0 = arith.constant 0 : i32
    return %arg0, %c0_i32 : i32, i32
  }
}

module attributes {stable_mosaic.version = 11 : i64} {
  func.func @_gate_attention_kernel(%arg0: i32, %arg1: memref<8x128xf32, #tpu.memory_space<vmem>>, %arg2: memref<8x128xf32, #tpu.memory_space<vmem>>, %arg3: memref<128x128xf32, #tpu.memory_space<vmem>>, %arg4: memref<128x128xf32, #tpu.memory_space<vmem>>, %arg5: memref<1x128xf32, #tpu.memory_space<vmem>>, %arg6: memref<8x128xf32, #tpu.memory_space<vmem>>) attributes {dimension_semantics = [#tpu.dimension_semantics<parallel>], iteration_bounds = array<i64: 2>, scalar_prefetch = 0 : i64, scratch_operands = 0 : i64, tpu.core_type = #tpu.core_type<tc>, window_params = [{transform_indices = @transform_0, window_bounds = array<i64: 8, 128>}, {transform_indices = @transform_1, window_bounds = array<i64: 8, 128>}, {pipeline_mode = #tpu.pipeline_mode<synchronous>, transform_indices = @transform_2, window_bounds = array<i64: 128, 128>}, {pipeline_mode = #tpu.pipeline_mode<synchronous>, transform_indices = @transform_3, window_bounds = array<i64: 128, 128>}, {pipeline_mode = #tpu.pipeline_mode<synchronous>, transform_indices = @transform_4, window_bounds = array<i64: 1, 128>}, {transform_indices = @transform_5, window_bounds = array<i64: 8, 128>}]} {
    %c0 = arith.constant 0 : index
    %c0_0 = arith.constant 0 : index
    %0 = vector.load %arg1[%c0, %c0_0] : memref<8x128xf32, #tpu.memory_space<vmem>>, vector<8x128xf32>
    %c0_1 = arith.constant 0 : index
    %c0_2 = arith.constant 0 : index
    %1 = vector.load %arg2[%c0_1, %c0_2] : memref<8x128xf32, #tpu.memory_space<vmem>>, vector<8x128xf32>
    %c0_3 = arith.constant 0 : index
    %c0_4 = arith.constant 0 : index
    %2 = vector.load %arg3[%c0_3, %c0_4] : memref<128x128xf32, #tpu.memory_space<vmem>>, vector<128x128xf32>
    %cst = arith.constant dense<0.000000e+00> : vector<8x128xf32>
    %3 = tpu.matmul %0, %2, %cst {dimension_numbers = #tpu.dot_dimension_numbers<[1], [0], [0], [1], [0, 0, 1, 1], [], []>} : vector<8x128xf32>, vector<128x128xf32>, vector<8x128xf32> -> vector<8x128xf32>
    %c0_5 = arith.constant 0 : index
    %c0_6 = arith.constant 0 : index
    %4 = vector.load %arg4[%c0_5, %c0_6] : memref<128x128xf32, #tpu.memory_space<vmem>>, vector<128x128xf32>
    %cst_7 = arith.constant dense<0.000000e+00> : vector<8x128xf32>
    %5 = tpu.matmul %1, %4, %cst_7 {dimension_numbers = #tpu.dot_dimension_numbers<[1], [0], [0], [1], [0, 0, 1, 1], [], []>} : vector<8x128xf32>, vector<128x128xf32>, vector<8x128xf32> -> vector<8x128xf32>
    %6 = arith.addf %3, %5 : vector<8x128xf32>
    %c0_8 = arith.constant 0 : index
    %c0_9 = arith.constant 0 : index
    %7 = vector.load %arg5[%c0_8, %c0_9] : memref<1x128xf32, #tpu.memory_space<vmem>>, vector<1x128xf32>
    %8 = vector.broadcast %7 : vector<1x128xf32> to vector<8x128xf32>
    %9 = arith.addf %6, %8 : vector<8x128xf32>
    %10 = arith.negf %9 : vector<8x128xf32>
    %11 = math.exp %10 : vector<8x128xf32>
    %cst_10 = arith.constant 1.000000e+00 : f32
    %12 = vector.broadcast %cst_10 : f32 to vector<8x128xf32>
    %13 = arith.addf %12, %11 : vector<8x128xf32>
    %14 = arith.divf %12, %13 : vector<8x128xf32>
    %15 = arith.mulf %14, %0 : vector<8x128xf32>
    %cst_11 = arith.constant 1.000000e+00 : f32
    %16 = vector.broadcast %cst_11 : f32 to vector<8x128xf32>
    %17 = arith.subf %16, %14 : vector<8x128xf32>
    %18 = arith.mulf %17, %1 : vector<8x128xf32>
    %19 = arith.addf %15, %18 : vector<8x128xf32>
    %c0_12 = arith.constant 0 : index
    %c0_13 = arith.constant 0 : index
    %20 = vector.load %arg6[%c0_12, %c0_13] : memref<8x128xf32, #tpu.memory_space<vmem>>, vector<8x128xf32>
    tpu.vector_store %arg6[%c0_12, %c0_13], %19 {strides = array<i32>} : memref<8x128xf32, #tpu.memory_space<vmem>>, vector<8x128xf32>,
    return
  }
  func.func @transform_0(%arg0: i32) -> (i32, i32) {
    %c0_i32 = arith.constant 0 : i32
    %c0_i32_0 = arith.constant 0 : i32
    return %arg0, %c0_i32 : i32, i32
  }
  func.func @transform_1(%arg0: i32) -> (i32, i32) {
    %c0_i32 = arith.constant 0 : i32
    %c0_i32_0 = arith.constant 0 : i32
    return %arg0, %c0_i32 : i32, i32
  }
  func.func @transform_2(%arg0: i32) -> (i32, i32) {
    %c0_i32 = arith.constant 0 : i32
    %c0_i32_0 = arith.constant 0 : i32
    %c0_i32_1 = arith.constant 0 : i32
    return %c0_i32, %c0_i32_0 : i32, i32
  }
  func.func @transform_3(%arg0: i32) -> (i32, i32) {
    %c0_i32 = arith.constant 0 : i32
    %c0_i32_0 = arith.constant 0 : i32
    %c0_i32_1 = arith.constant 0 : i32
    return %c0_i32, %c0_i32_0 : i32, i32
  }
  func.func @transform_4(%arg0: i32) -> (i32, i32) {
    %c0_i32 = arith.constant 0 : i32
    %c0_i32_0 = arith.constant 0 : i32
    %c0_i32_1 = arith.constant 0 : i32
    return %c0_i32, %c0_i32_0 : i32, i32
  }
  func.func @transform_5(%arg0: i32) -> (i32, i32) {
    %c0_i32 = arith.constant 0 : i32
    %c0_i32_0 = arith.constant 0 : i32
    return %arg0, %c0_i32 : i32, i32
  }
}

</mosaic_0001>

<bundles_post_ra>
// kernel: tpu_custom_call.1
= control target key start
LH: loop header
LB: loop body
LE: loop exit
PB: predicated region body
PF: predicated region fallthrough
CT: control target
= control target key end

     0   :  { %s1317_s0 = inlined_call_operand.hbm [shape: f32[16,128], index: 0, kind: input, shape index: {}]   ;;  %s1318_s1 = inlined_call_operand.hbm [shape: f32[16,128], index: 1, kind: input, shape index: {}]   ;;  %s1319_s2 = inlined_call_operand.hbm [shape: f32[128,128], index: 2, kind: input, shape index: {}]   ;;  %s1320_s3 = inlined_call_operand.hbm [shape: f32[128,128], index: 3, kind: input, shape index: {}]   ;;  %s1321_s4 = inlined_call_operand.vmem [shape: f32[1,128], index: 4, kind: input, shape index: {}]   ;;  %s1322_s5 = inlined_call_operand.hbm [shape: f32[16,128], index: 5, kind: output, shape index: {}]  }
   0x1   :  { %1327 = sst [smem:[#allocation16_spill]] %s1319_s2 }
   0x2   :  { %1328 = sst [smem:[#allocation17_spill]] %s1320_s3 }
   0x3   :  { %10 = vsyncpa [#allocation3], 0 }
   0x4   :  { %12 = vsyncpa [#allocation3 + $0x1], 0 }
   0x5   :  { %13 = vsyncpa [#allocation6], 0 }
   0x6   :  { %15 = vsyncpa [#allocation6 + $0x1], 0 }
   0x7   :  { %16 = vsyncpa [#allocation9], 0 }
   0x8   :  { %17 = vsyncpa [#allocation4], 0 }
   0x9   :  { %19 = vsyncpa [#allocation4 + $0x1], 0  ;;  %s1055_s18 = smov 0   ;;  %s1057_s19 = smov 0  }
   0xa   :  { %s1059_s20 = smov 0   ;;  %s1061_s21 = smov 0  }
   0xb LB: > { %s1076_s22 = sadd.s32 4294967295, %s1014_s21   ;;  %s625_s23 = sadd.s32 4294967294, %s1014_s21   ;;  %s1014_s21 = sphi %s1061_s21, %s1350_s21   ;;  %s1010_s20 = sphi %s1059_s20, %s1349_s20   ;;  %s1006_s19 = sphi %s1057_s19, %s1348_s19   ;;  %s1002_s18 = sphi %s1055_s18, %s1347_s18  }
   0xc   : > { %p45_p0 = scmp.ne.s32.totalorder %s1006_s19, %s1002_s18  ;;  %p1323_p1 = scmp.eq.s32.totalorder %s1076_s22, 0 }
   0xd   : > { %p164_p3 = scmp.eq.s32.totalorder %s625_s23, 1  ;;  %p626_p5 = scmp.ge.s32.totalorder %s1014_s21, 1 }
   0xe   : > { %p1085_p4 = por %p1323_p1, %p45_p0  ;;  %p171_p7 = scmp.lt.s32.totalorder %s1014_s21, 3 }
   0xf   : > { %p1090_p6 = por %p164_p3, %p45_p0  ;;  %s1016_s27 = smov [#allocation7]  }
  0x10   : > { %s1329_s24 = scalar_select %p1085_p4, 1, 0 }
  0x11   : > { %s1330_s25 = scalar_select %p1090_p6, 1, 0 }
  0x12   : > { %p1095_p8 = pnand %p626_p5, %p171_p7  ;;  %s183_s28 = sshll.u32 %s1016_s27, 4  ;;  %s184_s28 = int_to_ptr.vmem [resolvable:$true] %s183_s28 }
  0x13   : > { %s1017_s30 = smov [#allocation8]   ;;  %s841_s7 = scalar_lea.vmem %s184_s28, 2048 }
  0x14   : > { %s1331_s26 = scalar_select %p1095_p8, 1, 0 }
  0x15   : > { %p764_p9 = pneg %p1095_p8  ;;  %s196_s6 = sshll.u32 %s1017_s30, 4  ;;  %s197_s6 = int_to_ptr.vmem [resolvable:$true] %s196_s6 }
  0x16   : > { %p842_p13 = scmp.ne.s32.totalorder %s184_s28, %s841_s7  ;;  %p849_p5 = scmp.lt.s32.totalorder %s184_s28, %s184_s28 }
  0x17   : > { %p1104_p11 = pnand %p764_p9, %p1323_p1  ;;  %p850_p7 = scmp.lt.s32.totalorder %s841_s7, %s841_s7 }
  0x19   : > { %p832_p12 = pneg %p1104_p11  ;;  %p851_p10 = por %p850_p7, %p849_p5 }
  0x1b   : > { %p844_p0 = pnand %p842_p13, %p832_p12 }
  0x1d   : > { %p845_p3 = pneg %p844_p0 }
  0x1f   : > { %p852_p9 = pnand %p851_p10, %p845_p3 }
  0x21   : > { %855 = shalt.err (!%p852_p9)
}
  0x22   : > { %s1018_s8 = smov 128   ;;  %s1019_s9 = smov 8  }
  0x23   : > { %s1333_s2 = sld [smem:[#allocation16_spill]]  ;;  %s867_s12 = scalar_lea.vmem %s197_s6, 2048 }
  0x24   : > { %p868_p1 = scmp.ne.s32.totalorder %s197_s6, %s867_s12  ;;  %p875_p2 = scmp.lt.s32.totalorder %s197_s6, %s197_s6 }
  0x25   : > { %p876_p6 = scmp.lt.s32.totalorder %s867_s12, %s867_s12 }
  0x26   : > { %p870_p13 = pnand %p868_p1, %p832_p12 }
  0x27   : > { %p877_p5 = por %p876_p6, %p875_p2 }
  0x28   : > { %p871_p0 = pneg %p870_p13 }
  0x29   : > { %767 = dma.hbm_to_vmem [thread:$0]  (!%p1104_p11), %s1333_s2, 2048, %s184_s28, [#allocation6], %s1018_s8, %s1018_s8, %s1019_s9  }
  0x2a   : > { %p878_p10 = pnand %p877_p5, %p871_p0 }
  0x2c   : > { %881 = shalt.err (!%p878_p10)
}
  0x2d   : > { %s1334_s3 = sld [smem:[#allocation17_spill]]  ;;  %s1127_s15 = sadd.s32 1, %s1014_s21  }
  0x2e   : > { %s32_s16 = sadd.s32 1, %s1010_s20  ;;  %s29_s17 = ssub.s32 %s1014_s21, %s1127_s15 }
  0x2f   : > { %p39_p1 = scmp.ne.s32.totalorder %s1010_s20, %s1006_s19  ;;  %p30_p2 = scmp.eq.s32.totalorder %s29_s17, 0 }
  0x30   : > { %p40_p6 = scmp.eq.s32.totalorder %s1014_s21, 0  ;;  %p1335_p12 = scmp.eq.s32.totalorder %s1076_s22, 1 }
  0x31   : > { %p784_p7 = scmp.lt.s32.totalorder %s1014_s21, 2  ;;  %s213_s28 = sand.u32 1, %s1010_s20  }
  0x32   : > { %p1137_p3 = por %p1335_p12, %p39_p1  ;;  %p41_p9 = por %p40_p6, %p39_p1 }
  0x33   : > { %770 = dma.hbm_to_vmem [thread:$0]  (!%p1104_p11), %s1334_s3, 2048, %s197_s6, [#allocation9], %s1018_s8, %s1018_s8, %s1019_s9  }
  0x34   : > { %s1336_s23 = scalar_select %p1137_p3, 1, 0 }
  0x35   : > { %s1143_s27 = scalar_select %p30_p2, %s1010_s20, %s32_s16  }
  0x36   : > { %s1146_s29 = sshll.u32 %s213_s28, 3  ;;  %s631_s30 = sshll.u32 %s1014_s21, 7 }
  0x37   : > { %s1152_s8 = scalar_lea.hbm %s1317_s0, %s631_s30  ;;  %s217_s9 = scalar_lea.vmem [#allocation2], %s1146_s29 }
  0x38   : > { %s224_s10 = sshll.u32 %s217_s9, 4  ;;  %p1157_p11 = pnand %p784_p7, %p41_p9  ;;  %s1155_s10 = int_to_ptr.vmem [resolvable:$true] %s224_s10 }
  0x39   : > { %s1164_s14 = scalar_lea.hbm %s1318_s1, %s631_s30  ;;  %s231_s16 = sand.u32 1, %s1014_s21  }
  0x3a   : > { %s214_s17 = scalar_lea.sflag [#allocation3], %s213_s28  ;;  %s882_s6 = scalar_lea.hbm %s1152_s8, 128 }
  0x3b   : > { %p883_p13 = scmp.ne.s32.totalorder %s1152_s8, %s882_s6  ;;  %p884_p0 = pneg %p1157_p11 }
  0x3c   : > { %s887_s2 = scalar_lea.hbm %s1317_s0, 256  ;;  %p888_p1 = scmp.lt.s32.totalorder %s1152_s8, %s1317_s0 }
  0x3d   : > { %p885_p5 = pnand %p884_p0, %p883_p13  ;;  %p889_p2 = scmp.lt.s32.totalorder %s887_s2, %s882_s6 }
  0x3f   : > { %p886_p10 = pneg %p885_p5  ;;  %p890_p6 = por %p889_p2, %p888_p1 }
  0x41   : > { %p891_p12 = pnand %p890_p6, %p886_p10 }
  0x43   : > { %894 = shalt.err (!%p891_p12)
}
  0x44   : > { %s895_s28 = scalar_lea.vmem %s1155_s10, 128  ;;  %s1020_s30 = smov [#allocation2]  }
  0x45   : > { %p896_p7 = scmp.ne.s32.totalorder %s1155_s10, %s895_s28  ;;  %s900_s13 = sshll.u32 %s1020_s30, 4  ;;  %s901_s13 = int_to_ptr.vmem [resolvable:$false] %s900_s13 }
  0x46   : > { %s902_s7 = scalar_lea.vmem %s901_s13, 256  ;;  %p903_p5 = scmp.lt.s32.totalorder %s1155_s10, %s901_s13 }
  0x47   : > { %p898_p9 = pnand %p896_p7, %p884_p0  ;;  %p904_p3 = scmp.lt.s32.totalorder %s902_s7, %s895_s28 }
  0x49   : > { %p899_p13 = pneg %p898_p9  ;;  %p905_p4 = por %p904_p3, %p903_p5 }
  0x4b   : > { %p906_p1 = pnand %p905_p4, %p899_p13 }
  0x4d   : > { %909 = shalt.err (!%p906_p1)
}
  0x4e   : > { %774 = dma.hbm_to_vmem [thread:$0]  (!%p1157_p11), %s1152_s8, 128, %s1155_s10, %s214_s17  }
  0x4f   : > { %s235_s2 = scalar_lea.vmem [#allocation5], %s1146_s29  ;;  %s232_s6 = scalar_lea.sflag [#allocation6], %s231_s16 }
  0x50   : > { %s242_s3 = sshll.u32 %s235_s2, 4  ;;  %s910_s9 = scalar_lea.hbm %s1164_s14, 128  ;;  %s243_s3 = int_to_ptr.vmem [resolvable:$true] %s242_s3 }
  0x51   : > { %p911_p3 = scmp.ne.s32.totalorder %s1164_s14, %s910_s9  ;;  %s915_s30 = scalar_lea.hbm %s1318_s1, 256 }
  0x52   : > { %p916_p2 = scmp.lt.s32.totalorder %s1164_s14, %s1318_s1  ;;  %p917_p6 = scmp.lt.s32.totalorder %s915_s30, %s910_s9 }
  0x53   : > { %p913_p4 = pnand %p911_p3, %p884_p0 }
  0x54   : > { %p918_p12 = por %p917_p6, %p916_p2 }
  0x55   : > { %p914_p10 = pneg %p913_p4 }
  0x57   : > { %p919_p7 = pnand %p918_p12, %p914_p10 }
  0x59   : > { %922 = shalt.err (!%p919_p7)
}
  0x5a   : > { %s923_s29 = scalar_lea.vmem %s243_s3, 128  ;;  %s1021_s8 = smov [#allocation5]  }
  0x5b   : > { %p924_p9 = scmp.ne.s32.totalorder %s243_s3, %s923_s29  ;;  %s928_s10 = sshll.u32 %s1021_s8, 4  ;;  %s929_s10 = int_to_ptr.vmem [resolvable:$false] %s928_s10 }
  0x5c   : > { %s930_s16 = scalar_lea.vmem %s929_s10, 256  ;;  %p931_p1 = scmp.lt.s32.totalorder %s243_s3, %s929_s10 }
  0x5d   : > { %p926_p13 = pnand %p924_p9, %p884_p0  ;;  %p932_p3 = scmp.lt.s32.totalorder %s930_s16, %s923_s29 }
  0x5f   : > { %p927_p5 = pneg %p926_p13  ;;  %p933_p4 = por %p932_p3, %p931_p1 }
  0x61   : > { %p934_p8 = pnand %p933_p4, %p927_p5 }
  0x63   : > { %937 = shalt.err (!%p934_p8)
}
  0x64   : > { %777 = dma.hbm_to_vmem [thread:$0]  (!%p1157_p11), %s1164_s14, 128, %s243_s3, %s232_s6  }
  0x65   : > { %p1338_p10 = scmp.ne.s32.totalorder %s1331_s26, 0 }
  0x66   : > { %s1215_s17 = sand.u32 (!%p1338_p10), 1, %s1006_s19   ;;  %p1339_p0 = scmp.ne.s32.totalorder (!%p1338_p10), %s1329_s24, 0 }
  0x67   : > { %251 = sbr.rel (%p1338_p10) target bundleno = 400 (0x190), region = 40  ;;  %s1218_s2 = sshll.u32 (!%p1338_p10), %s1215_s17, 3 }
  0x68   : > { %s254_s9 = scalar_lea.sflag (!%p1338_p10), [#allocation3], %s1215_s17  ;;  %s257_s12 = scalar_lea.vmem (!%p1338_p10), [#allocation2], %s1218_s2 }
  0x6c   : > { %981 = dma.done.wait (%p1339_p0), %s254_s9, 128  }
  0x6d   : > { %983 = vsyncadd (%p1339_p0), %s254_s9, 4294967168  ;;  %s262_s26 = sand.u32 1, %s1076_s22   ;;  %s266_s14 = scalar_lea.vmem [#allocation5], %s1218_s2 }
  0x6e   : > { %s263_s11 = scalar_lea.sflag [#allocation6], %s262_s26 }
  0x6f   : > { %985 = dma.done.wait (%p1339_p0), %s263_s11, 128  }
  0x70   : > { %987 = vsyncadd (%p1339_p0), %s263_s11, 4294967168  ;;  %p1340_p8 = scmp.eq.s32.totalorder %s1076_s22, 0 }
  0x72   : > { %989 = dma.done.wait (%p1340_p8), [#allocation6], 2048   ;;  %p1341_p11 = pmov %p1340_p8 }
  0x73   : > { %p1342_p2 = pmov %p1340_p8 }
  0x74   : > { %991 = vsyncadd (%p1341_p11), [#allocation6], 4294965248 }
  0x75   : > { %993 = dma.done.wait (%p1342_p2), [#allocation9], 2048   ;;  %p1343_p6 = pmov %p1342_p2 }
  0x76   : > { %v1022_v0 = vmov 0.0   ;;  %vm1023_vm0 = vmmov 0   ;;  %v339_v1 = vld [vmem:[#allocation8 + $0x78] sm:$0xff]  ;;  %v338_v3 = vld [vmem:[#allocation8 + $0x70] sm:$0xff]  ;;  %v337_v5 = vld [vmem:[#allocation8 + $0x68] sm:$0xff]  ;;  %s643_s6 = sshll.u32 %s1076_s22, 7 }
  0x77   : > { %995 = vsyncadd (%p1343_p6), [#allocation9], 4294965248  ;;  %680 = vmatprep.subr.mxu0 %v1022_v0  ;;  %715 = vmatprep.subr.mxu1 %v1022_v0  ;;  %v323_v2 = vld [vmem:[#allocation7 + $0x78] sm:$0xff]  ;;  %v322_v4 = vld [vmem:[#allocation7 + $0x70] sm:$0xff]  ;;  %s305_s28 = scalar_lea.vmem [#allocation10], %s1218_s2  ;;  %s511_s29 = scalar_lea.hbm %s1322_s5, %s643_s6 }
  0x78   : > { %712 = vmatprep.mubr.msk.f32.mxu0 %vm1023_vm0, %v1022_v0  ;;  %747 = vmatprep.mubr.msk.f32.mxu1 %vm1023_vm0, %v1022_v0  ;;  %v321_v6 = vld [vmem:[#allocation7 + $0x68] sm:$0xff]  ;;  %v336_v7 = vld [vmem:[#allocation8 + $0x60] sm:$0xff]  ;;  %v335_v9 = vld [vmem:[#allocation8 + $0x58] sm:$0xff]  ;;  %s513_s30 = sshll.u32 %s305_s28, 4  ;;  %s500_s8 = scalar_lea.sflag [#allocation4], %s1215_s17  ;;  %s514_s30 = int_to_ptr.vmem [resolvable:$true] %s513_s30 }
  0x79   : > { %681 = vmatpush3.msra.mxu0 %v339_v1  ;;  %716 = vmatpush3.msra.mxu1 %v323_v2  ;;  %v320_v8 = vld [vmem:[#allocation7 + $0x60] sm:$0xff]  ;;  %v319_v10 = vld [vmem:[#allocation7 + $0x58] sm:$0xff]  ;;  %v334_v11 = vld [vmem:[#allocation8 + $0x50] sm:$0xff]  ;;  %s938_s10 = scalar_lea.vmem %s514_s30, 128  ;;  %p1344_p7 = scmp.ne.s32.totalorder %s1336_s23, 0 }
  0x7a   : > { %682 = vmatprep.subr.mxu0 %v1022_v0  ;;  %717 = vmatprep.subr.mxu1 %v1022_v0  ;;  %v318_v12 = vld [vmem:[#allocation7 + $0x50] sm:$0xff]  ;;  %v333_v13 = vld [vmem:[#allocation8 + $0x48] sm:$0xff]  ;;  %v332_v15 = vld [vmem:[#allocation8 + $0x40] sm:$0xff]  ;;  %p939_p12 = scmp.ne.s32.totalorder %s514_s30, %s938_s10  ;;  %s1024_s16 = smov [#allocation10]  }
  0x7b   : > { %683 = vmatpush3.msra.mxu0 %v338_v3  ;;  %718 = vmatpush3.msra.mxu1 %v322_v4  ;;  %v317_v14 = vld [vmem:[#allocation7 + $0x48] sm:$0xff]  ;;  %v316_v16 = vld [vmem:[#allocation7 + $0x40] sm:$0xff]  ;;  %v331_v17 = vld [vmem:[#allocation8 + $0x38] sm:$0xff]  ;;  %s942_s9 = sshll.u32 %s1024_s16, 4  ;;  %s943_s9 = int_to_ptr.vmem [resolvable:$false] %s942_s9 }
  0x7c   : > { %684 = vmatprep.subr.mxu0 %v1022_v0  ;;  %719 = vmatprep.subr.mxu1 %v1022_v0  ;;  %v315_v18 = vld [vmem:[#allocation7 + $0x38] sm:$0xff]  ;;  %v330_v19 = vld [vmem:[#allocation8 + $0x30] sm:$0xff]  ;;  %v329_v21 = vld [vmem:[#allocation8 + $0x28] sm:$0xff]  ;;  %p940_p9 = pnand %p939_p12, %p1344_p7  ;;  %s944_s22 = scalar_lea.vmem %s943_s9, 256 }
  0x7d   : > { %685 = vmatpush3.msra.mxu0 %v337_v5  ;;  %720 = vmatpush3.msra.mxu1 %v321_v6  ;;  %v314_v20 = vld [vmem:[#allocation7 + $0x30] sm:$0xff]  ;;  %v313_v22 = vld [vmem:[#allocation7 + $0x28] sm:$0xff]  ;;  %v328_v23 = vld [vmem:[#allocation8 + $0x20] sm:$0xff]  ;;  %p945_p5 = scmp.lt.s32.totalorder %s514_s30, %s943_s9  ;;  %p946_p1 = scmp.lt.s32.totalorder %s944_s22, %s938_s10 }
  0x7e   : > { %686 = vmatprep.subr.mxu0 %v1022_v0  ;;  %721 = vmatprep.subr.mxu1 %v1022_v0  ;;  %v312_v24 = vld [vmem:[#allocation7 + $0x20] sm:$0xff]  ;;  %v327_v25 = vld [vmem:[#allocation8 + $0x18] sm:$0xff]  ;;  %v326_v27 = vld [vmem:[#allocation8 + $0x10] sm:$0xff]  ;;  %p941_p13 = pneg %p940_p9 }
  0x7f   : > { %687 = vmatpush3.msra.mxu0 %v336_v7  ;;  %722 = vmatpush3.msra.mxu1 %v320_v8  ;;  %v311_v26 = vld [vmem:[#allocation7 + $0x18] sm:$0xff]  ;;  %v310_v28 = vld [vmem:[#allocation7 + $0x10] sm:$0xff]  ;;  %v325_v29 = vld [vmem:[#allocation8 + $0x8] sm:$0xff]  ;;  %p947_p3 = por %p946_p1, %p945_p5 }
  0x80   : > { %688 = vmatprep.subr.mxu0 %v1022_v0  ;;  %723 = vmatprep.subr.mxu1 %v1022_v0  ;;  %v309_v30 = vld [vmem:[#allocation7 + $0x8] sm:$0xff]  ;;  %v324_v31 = vld [vmem:[#allocation8] sm:$0xff]  ;;  %v307_v33 = vld [vmem:[%s266_s14] sm:$0xff] }
  0x81   : > { %689 = vmatpush3.msra.mxu0 %v335_v9  ;;  %724 = vmatpush3.msra.mxu1 %v319_v10  ;;  %v308_v32 = vld [vmem:[#allocation7] sm:$0xff]  ;;  %p948_p4 = pnand %p947_p3, %p941_p13 }
  0x82   : > { %690 = vmatprep.subr.mxu0 %v1022_v0  ;;  %725 = vmatprep.subr.mxu1 %v1022_v0  ;;  %v306_v34 = vld [vmem:[%s257_s12] sm:$0xff] }
  0x83   : > { %691 = vmatpush3.msra.mxu0 %v334_v11  ;;  %726 = vmatpush3.msra.mxu1 %v318_v12  ;;  %v640_v37 = vld [vmem:[%s1321_s4] ss:$0 sm:$0xff] }
  0x84   : > { %692 = vmatprep.subr.mxu0 %v1022_v0  ;;  %727 = vmatprep.subr.mxu1 %v1022_v0 }
  0x85   : > { %693 = vmatpush3.msra.mxu0 %v333_v13  ;;  %728 = vmatpush3.msra.mxu1 %v317_v14 }
  0x86   : > { %694 = vmatprep.subr.mxu0 %v1022_v0  ;;  %729 = vmatprep.subr.mxu1 %v1022_v0 }
  0x87   : > { %695 = vmatpush3.msra.mxu0 %v332_v15  ;;  %730 = vmatpush3.msra.mxu1 %v316_v16 }
  0x88   : > { %696 = vmatprep.subr.mxu0 %v1022_v0  ;;  %731 = vmatprep.subr.mxu1 %v1022_v0 }
  0x89   : > { %697 = vmatpush3.msra.mxu0 %v331_v17  ;;  %732 = vmatpush3.msra.mxu1 %v315_v18 }
  0x8a   : > { %698 = vmatprep.subr.mxu0 %v1022_v0  ;;  %733 = vmatprep.subr.mxu1 %v1022_v0 }
  0x8b   : > { %699 = vmatpush3.msra.mxu0 %v330_v19  ;;  %734 = vmatpush3.msra.mxu1 %v314_v20 }
  0x8c   : > { %700 = vmatprep.subr.mxu0 %v1022_v0  ;;  %735 = vmatprep.subr.mxu1 %v1022_v0 }
  0x8d   : > { %701 = vmatpush3.msra.mxu0 %v329_v21  ;;  %736 = vmatpush3.msra.mxu1 %v313_v22 }
  0x8e   : > { %702 = vmatprep.subr.mxu0 %v1022_v0  ;;  %737 = vmatprep.subr.mxu1 %v1022_v0 }
  0x8f   : > { %703 = vmatpush3.msra.mxu0 %v328_v23  ;;  %738 = vmatpush3.msra.mxu1 %v312_v24 }
  0x90   : > { %704 = vmatprep.subr.mxu0 %v1022_v0  ;;  %739 = vmatprep.subr.mxu1 %v1022_v0 }
  0x91   : > { %705 = vmatpush3.msra.mxu0 %v327_v25  ;;  %740 = vmatpush3.msra.mxu1 %v311_v26 }
  0x92   : > { %706 = vmatprep.subr.mxu0 %v1022_v0  ;;  %741 = vmatprep.subr.mxu1 %v1022_v0 }
  0x93   : > { %707 = vmatpush3.msra.mxu0 %v326_v27  ;;  %742 = vmatpush3.msra.mxu1 %v310_v28 }
  0x94   : > { %708 = vmatprep.subr.mxu0 %v1022_v0  ;;  %743 = vmatprep.subr.mxu1 %v1022_v0 }
  0x95   : > { %709 = vmatpush3.msra.mxu0 %v325_v29  ;;  %744 = vmatpush3.msra.mxu1 %v309_v30 }
  0x96   : > { %710 = vmatprep.subr.mxu0 %v1022_v0  ;;  %745 = vmatprep.subr.mxu1 %v1022_v0 }
  0x97   : > { %711 = vmatpush3.msra.mxu0 %v324_v31  ;;  %746 = vmatpush3.msra.mxu1 %v308_v32 }
  0x98   : > { %713 = vmatmul.mubr.f32.vlgmr.msra.gmra.mxu0 %v307_v33  ;;  %748 = vmatmul.mubr.f32.vlgmr.msra.gmra.mxu1 %v306_v34 }
 0x158   : > { %v406_v35 = vpop.f32.mrf.mxu0  ;;  %v476_v36 = vpop.f32.mrf.mxu1 }
 0x159   : > { %v477_v38 = vadd.f32 %v476_v36, %v406_v35 }
 0x15a   : > { %v714_v39 = vpop.f32.mrf.mxu0  ;;  %v749_v40 = vpop.f32.mrf.mxu1 }
 0x15b   : > { %v487_v41 = vadd.f32 %v640_v37, %v477_v38 }
 0x15d   : > { %v641_v42 = vmul.f32 -1.442695, %v487_v41 }
 0x15f   : > { %826 = vpow2.f32 %v641_v42 }
 0x16c   : > { %v827_v43 = vpop.eup %826 }
 0x16d   : > { %v491_v44 = vadd.f32 1.0, %v827_v43 }
 0x16f   : > { %828 = vrcp.f32 %v491_v44 }
 0x17c   : > { %v829_v45 = vpop.eup %828 }
 0x17d   : > { %v495_v46 = vsub.f32 1.0, %v829_v45  ;;  %v494_v47 = vmul.f32 %v829_v45, %v306_v34 }
 0x17f   : > { %v496_v48 = vmul.f32 %v495_v46, %v307_v33 }
 0x181   : > { %v497_v49 = vadd.f32 %v496_v48, %v494_v47 }
 0x183   : > { %498 = vst [vmem:[%s305_s28] sm:$0xff] %v497_v49 }
 0x184   : > { %951 = shalt.err (!%p948_p4)
}
 0x185   : > { %s952_s2 = scalar_lea.hbm %s511_s29, 128  ;;  %s956_s26 = scalar_lea.hbm %s1322_s5, 256 }
 0x186   : > { %p953_p10 = scmp.ne.s32.totalorder %s511_s29, %s952_s2  ;;  %p957_p11 = scmp.lt.s32.totalorder %s511_s29, %s1322_s5 }
 0x187   : > { %p958_p2 = scmp.lt.s32.totalorder %s956_s26, %s952_s2 }
 0x188   : > { %p954_p0 = pnand %p953_p10, %p1344_p7 }
 0x189   : > { %p959_p6 = por %p958_p2, %p957_p11 }
 0x18a   : > { %p955_p8 = pneg %p954_p0 }
 0x18c   : > { %p960_p12 = pnand %p959_p6, %p955_p8 }
 0x18e   : > { %963 = shalt.err (!%p960_p12)
}
 0x18f   : > { %762 = dma.vmem_to_hbm [thread:$0]  (%p1344_p7), %s514_s30, 128, %s511_s29, %s500_s8  }
 0x190 PF: > { %s525_s24 = sand.u32 1, %s1002_s18   ;;  %p1345_p9 = scmp.ne.s32.totalorder %s1330_s25, 0 }
 0x191   : > { %p1346_p13 = scmp.ge.s32.totalorder %s1014_s21, 2  ;;  %s526_s3 = scalar_lea.sflag [#allocation4], %s525_s24 }
 0x193   : > { %p779_p5 = pnand %p1346_p13, %p1345_p9 }
 0x195   : > { %p780_p1 = pneg %p779_p5 }
 0x197   : > { %997 = dma.done.wait (%p780_p1), %s526_s3, 128  }
 0x198   : > { %999 = vsyncadd (%p780_p1), %s526_s3, 4294967168  ;;  %p22_p3 = scmp.ge.s32.totalorder %s1127_s15, 4   ;;  %s1347_s18 = smov %s1006_s19 }
 0x199   : > { %s1348_s19 = smov %s1010_s20  ;;  %s1349_s20 = smov %s1143_s27 }
 0x19a   : > { %s1350_s21 = smov %s1127_s15  ;;  %24 = sbr.rel (!%p22_p3) target bundleno = 11 (0xb), region = 106 }
 0x19f   :  { %531 = vsyncpa [#allocation3], 1 }
 0x1a0   :  { %533 = vsyncpa [#allocation3 + $0x1], 1 }
 0x1a1   :  { %534 = vsyncpa [#allocation6], 1 }
 0x1a2   :  { %536 = vsyncpa [#allocation6 + $0x1], 1 }
 0x1a3   :  { %537 = vsyncpa [#allocation9], 1 }
 0x1a4   :  { %538 = vsyncpa [#allocation4], 1 }
 0x1a5   :  { %540 = vsyncpa [#allocation4 + $0x1], 1 }

// kernel: tpu_custom_call.1
= control target key start
LH: loop header
LB: loop body
LE: loop exit
PB: predicated region body
PF: predicated region fallthrough
CT: control target
= control target key end

     0   :  { %s1317_s0 = inlined_call_operand.hbm [shape: f32[16,128], index: 0, kind: input, shape index: {}]   ;;  %s1318_s1 = inlined_call_operand.hbm [shape: f32[16,128], index: 1, kind: input, shape index: {}]   ;;  %s1319_s2 = inlined_call_operand.hbm [shape: f32[128,128], index: 2, kind: input, shape index: {}]   ;;  %s1320_s3 = inlined_call_operand.hbm [shape: f32[128,128], index: 3, kind: input, shape index: {}]   ;;  %s1321_s4 = inlined_call_operand.vmem [shape: f32[1,128], index: 4, kind: input, shape index: {}]   ;;  %s1322_s5 = inlined_call_operand.hbm [shape: f32[16,128], index: 5, kind: output, shape index: {}]  }
   0x1   :  { %1327 = sst [smem:[#allocation16_spill]] %s1319_s2 }
   0x2   :  { %1328 = sst [smem:[#allocation17_spill]] %s1320_s3 }
   0x3   :  { %10 = vsyncpa [#allocation3], 0 }
   0x4   :  { %12 = vsyncpa [#allocation3 + $0x1], 0 }
   0x5   :  { %13 = vsyncpa [#allocation6], 0 }
   0x6   :  { %15 = vsyncpa [#allocation6 + $0x1], 0 }
   0x7   :  { %16 = vsyncpa [#allocation9], 0 }
   0x8   :  { %17 = vsyncpa [#allocation4], 0 }
   0x9   :  { %19 = vsyncpa [#allocation4 + $0x1], 0  ;;  %s1055_s18 = smov 0   ;;  %s1057_s19 = smov 0  }
   0xa   :  { %s1059_s20 = smov 0   ;;  %s1061_s21 = smov 0  }
   0xb LB: > { %s1076_s22 = sadd.s32 4294967295, %s1014_s21   ;;  %s625_s23 = sadd.s32 4294967294, %s1014_s21   ;;  %s1014_s21 = sphi %s1061_s21, %s1350_s21   ;;  %s1010_s20 = sphi %s1059_s20, %s1349_s20   ;;  %s1006_s19 = sphi %s1057_s19, %s1348_s19   ;;  %s1002_s18 = sphi %s1055_s18, %s1347_s18  }
   0xc   : > { %p45_p0 = scmp.ne.s32.totalorder %s1006_s19, %s1002_s18  ;;  %p1323_p1 = scmp.eq.s32.totalorder %s1076_s22, 0 }
   0xd   : > { %p164_p3 = scmp.eq.s32.totalorder %s625_s23, 1  ;;  %p626_p5 = scmp.ge.s32.totalorder %s1014_s21, 1 }
   0xe   : > { %p1085_p4 = por %p1323_p1, %p45_p0  ;;  %p171_p7 = scmp.lt.s32.totalorder %s1014_s21, 3 }
   0xf   : > { %p1090_p6 = por %p164_p3, %p45_p0  ;;  %s1016_s27 = smov [#allocation7]  }
  0x10   : > { %s1329_s24 = scalar_select %p1085_p4, 1, 0 }
  0x11   : > { %s1330_s25 = scalar_select %p1090_p6, 1, 0 }
  0x12   : > { %p1095_p8 = pnand %p626_p5, %p171_p7  ;;  %s183_s28 = sshll.u32 %s1016_s27, 4  ;;  %s184_s28 = int_to_ptr.vmem [resolvable:$true] %s183_s28 }
  0x13   : > { %s1017_s30 = smov [#allocation8]   ;;  %s841_s7 = scalar_lea.vmem %s184_s28, 2048 }
  0x14   : > { %s1331_s26 = scalar_select %p1095_p8, 1, 0 }
  0x15   : > { %p764_p9 = pneg %p1095_p8  ;;  %s196_s6 = sshll.u32 %s1017_s30, 4  ;;  %s197_s6 = int_to_ptr.vmem [resolvable:$true] %s196_s6 }
  0x16   : > { %p842_p13 = scmp.ne.s32.totalorder %s184_s28, %s841_s7  ;;  %p849_p5 = scmp.lt.s32.totalorder %s184_s28, %s184_s28 }
  0x17   : > { %p1104_p11 = pnand %p764_p9, %p1323_p1  ;;  %p850_p7 = scmp.lt.s32.totalorder %s841_s7, %s841_s7 }
  0x19   : > { %p832_p12 = pneg %p1104_p11  ;;  %p851_p10 = por %p850_p7, %p849_p5 }
  0x1b   : > { %p844_p0 = pnand %p842_p13, %p832_p12 }
  0x1d   : > { %p845_p3 = pneg %p844_p0 }
  0x1f   : > { %p852_p9 = pnand %p851_p10, %p845_p3 }
  0x21   : > { %855 = shalt.err (!%p852_p9)
}
  0x22   : > { %s1018_s8 = smov 128   ;;  %s1019_s9 = smov 8  }
  0x23   : > { %s1333_s2 = sld [smem:[#allocation16_spill]]  ;;  %s867_s12 = scalar_lea.vmem %s197_s6, 2048 }
  0x24   : > { %p868_p1 = scmp.ne.s32.totalorder %s197_s6, %s867_s12  ;;  %p875_p2 = scmp.lt.s32.totalorder %s197_s6, %s197_s6 }
  0x25   : > { %p876_p6 = scmp.lt.s32.totalorder %s867_s12, %s867_s12 }
  0x26   : > { %p870_p13 = pnand %p868_p1, %p832_p12 }
  0x27   : > { %p877_p5 = por %p876_p6, %p875_p2 }
  0x28   : > { %p871_p0 = pneg %p870_p13 }
  0x29   : > { %767 = dma.hbm_to_vmem [thread:$0]  (!%p1104_p11), %s1333_s2, 2048, %s184_s28, [#allocation6], %s1018_s8, %s1018_s8, %s1019_s9  }
  0x2a   : > { %p878_p10 = pnand %p877_p5, %p871_p0 }
  0x2c   : > { %881 = shalt.err (!%p878_p10)
}
  0x2d   : > { %s1334_s3 = sld [smem:[#allocation17_spill]]  ;;  %s1127_s15 = sadd.s32 1, %s1014_s21  }
  0x2e   : > { %s32_s16 = sadd.s32 1, %s1010_s20  ;;  %s29_s17 = ssub.s32 %s1014_s21, %s1127_s15 }
  0x2f   : > { %p39_p1 = scmp.ne.s32.totalorder %s1010_s20, %s1006_s19  ;;  %p30_p2 = scmp.eq.s32.totalorder %s29_s17, 0 }
  0x30   : > { %p40_p6 = scmp.eq.s32.totalorder %s1014_s21, 0  ;;  %p1335_p12 = scmp.eq.s32.totalorder %s1076_s22, 1 }
  0x31   : > { %p784_p7 = scmp.lt.s32.totalorder %s1014_s21, 2  ;;  %s213_s28 = sand.u32 1, %s1010_s20  }
  0x32   : > { %p1137_p3 = por %p1335_p12, %p39_p1  ;;  %p41_p9 = por %p40_p6, %p39_p1 }
  0x33   : > { %770 = dma.hbm_to_vmem [thread:$0]  (!%p1104_p11), %s1334_s3, 2048, %s197_s6, [#allocation9], %s1018_s8, %s1018_s8, %s1019_s9  }
  0x34   : > { %s1336_s23 = scalar_select %p1137_p3, 1, 0 }
  0x35   : > { %s1143_s27 = scalar_select %p30_p2, %s1010_s20, %s32_s16  }
  0x36   : > { %s1146_s29 = sshll.u32 %s213_s28, 3  ;;  %s631_s30 = sshll.u32 %s1014_s21, 7 }
  0x37   : > { %s1152_s8 = scalar_lea.hbm %s1317_s0, %s631_s30  ;;  %s217_s9 = scalar_lea.vmem [#allocation2], %s1146_s29 }
  0x38   : > { %s224_s10 = sshll.u32 %s217_s9, 4  ;;  %p1157_p11 = pnand %p784_p7, %p41_p9  ;;  %s1155_s10 = int_to_ptr.vmem [resolvable:$true] %s224_s10 }
  0x39   : > { %s1164_s14 = scalar_lea.hbm %s1318_s1, %s631_s30  ;;  %s231_s16 = sand.u32 1, %s1014_s21  }
  0x3a   : > { %s214_s17 = scalar_lea.sflag [#allocation3], %s213_s28  ;;  %s882_s6 = scalar_lea.hbm %s1152_s8, 128 }
  0x3b   : > { %p883_p13 = scmp.ne.s32.totalorder %s1152_s8, %s882_s6  ;;  %p884_p0 = pneg %p1157_p11 }
  0x3c   : > { %s887_s2 = scalar_lea.hbm %s1317_s0, 256  ;;  %p888_p1 = scmp.lt.s32.totalorder %s1152_s8, %s1317_s0 }
  0x3d   : > { %p885_p5 = pnand %p884_p0, %p883_p13  ;;  %p889_p2 = scmp.lt.s32.totalorder %s887_s2, %s882_s6 }
  0x3f   : > { %p886_p10 = pneg %p885_p5  ;;  %p890_p6 = por %p889_p2, %p888_p1 }
  0x41   : > { %p891_p12 = pnand %p890_p6, %p886_p10 }
  0x43   : > { %894 = shalt.err (!%p891_p12)
}
  0x44   : > { %s895_s28 = scalar_lea.vmem %s1155_s10, 128  ;;  %s1020_s30 = smov [#allocation2]  }
  0x45   : > { %p896_p7 = scmp.ne.s32.totalorder %s1155_s10, %s895_s28  ;;  %s900_s13 = sshll.u32 %s1020_s30, 4  ;;  %s901_s13 = int_to_ptr.vmem [resolvable:$false] %s900_s13 }
  0x46   : > { %s902_s7 = scalar_lea.vmem %s901_s13, 256  ;;  %p903_p5 = scmp.lt.s32.totalorder %s1155_s10, %s901_s13 }
  0x47   : > { %p898_p9 = pnand %p896_p7, %p884_p0  ;;  %p904_p3 = scmp.lt.s32.totalorder %s902_s7, %s895_s28 }
  0x49   : > { %p899_p13 = pneg %p898_p9  ;;  %p905_p4 = por %p904_p3, %p903_p5 }
  0x4b   : > { %p906_p1 = pnand %p905_p4, %p899_p13 }
  0x4d   : > { %909 = shalt.err (!%p906_p1)
}
  0x4e   : > { %774 = dma.hbm_to_vmem [thread:$0]  (!%p1157_p11), %s1152_s8, 128, %s1155_s10, %s214_s17  }
  0x4f   : > { %s235_s2 = scalar_lea.vmem [#allocation5], %s1146_s29  ;;  %s232_s6 = scalar_lea.sflag [#allocation6], %s231_s16 }
  0x50   : > { %s242_s3 = sshll.u32 %s235_s2, 4  ;;  %s910_s9 = scalar_lea.hbm %s1164_s14, 128  ;;  %s243_s3 = int_to_ptr.vmem [resolvable:$true] %s242_s3 }
  0x51   : > { %p911_p3 = scmp.ne.s32.totalorder %s1164_s14, %s910_s9  ;;  %s915_s30 = scalar_lea.hbm %s1318_s1, 256 }
  0x52   : > { %p916_p2 = scmp.lt.s32.totalorder %s1164_s14, %s1318_s1  ;;  %p917_p6 = scmp.lt.s32.totalorder %s915_s30, %s910_s9 }
  0x53   : > { %p913_p4 = pnand %p911_p3, %p884_p0 }
  0x54   : > { %p918_p12 = por %p917_p6, %p916_p2 }
  0x55   : > { %p914_p10 = pneg %p913_p4 }
  0x57   : > { %p919_p7 = pnand %p918_p12, %p914_p10 }
  0x59   : > { %922 = shalt.err (!%p919_p7)
}
  0x5a   : > { %s923_s29 = scalar_lea.vmem %s243_s3, 128  ;;  %s1021_s8 = smov [#allocation5]  }
  0x5b   : > { %p924_p9 = scmp.ne.s32.totalorder %s243_s3, %s923_s29  ;;  %s928_s10 = sshll.u32 %s1021_s8, 4  ;;  %s929_s10 = int_to_ptr.vmem [resolvable:$false] %s928_s10 }
  0x5c   : > { %s930_s16 = scalar_lea.vmem %s929_s10, 256  ;;  %p931_p1 = scmp.lt.s32.totalorder %s243_s3, %s929_s10 }
  0x5d   : > { %p926_p13 = pnand %p924_p9, %p884_p0  ;;  %p932_p3 = scmp.lt.s32.totalorder %s930_s16, %s923_s29 }
  0x5f   : > { %p927_p5 = pneg %p926_p13  ;;  %p933_p4 = por %p932_p3, %p931_p1 }
  0x61   : > { %p934_p8 = pnand %p933_p4, %p927_p5 }
  0x63   : > { %937 = shalt.err (!%p934_p8)
}
  0x64   : > { %777 = dma.hbm_to_vmem [thread:$0]  (!%p1157_p11), %s1164_s14, 128, %s243_s3, %s232_s6  }
  0x65   : > { %p1338_p10 = scmp.ne.s32.totalorder %s1331_s26, 0 }
  0x66   : > { %s1215_s17 = sand.u32 (!%p1338_p10), 1, %s1006_s19   ;;  %p1339_p0 = scmp.ne.s32.totalorder (!%p1338_p10), %s1329_s24, 0 }
  0x67   : > { %251 = sbr.rel (%p1338_p10) target bundleno = 400 (0x190), region = 40  ;;  %s1218_s2 = sshll.u32 (!%p1338_p10), %s1215_s17, 3 }
  0x68   : > { %s254_s9 = scalar_lea.sflag (!%p1338_p10), [#allocation3], %s1215_s17  ;;  %s257_s12 = scalar_lea.vmem (!%p1338_p10), [#allocation2], %s1218_s2 }
  0x6c   : > { %981 = dma.done.wait (%p1339_p0), %s254_s9, 128  }
  0x6d   : > { %983 = vsyncadd (%p1339_p0), %s254_s9, 4294967168  ;;  %s262_s26 = sand.u32 1, %s1076_s22   ;;  %s266_s14 = scalar_lea.vmem [#allocation5], %s1218_s2 }
  0x6e   : > { %s263_s11 = scalar_lea.sflag [#allocation6], %s262_s26 }
  0x6f   : > { %985 = dma.done.wait (%p1339_p0), %s263_s11, 128  }
  0x70   : > { %987 = vsyncadd (%p1339_p0), %s263_s11, 4294967168  ;;  %p1340_p8 = scmp.eq.s32.totalorder %s1076_s22, 0 }
  0x72   : > { %989 = dma.done.wait (%p1340_p8), [#allocation6], 2048   ;;  %p1341_p11 = pmov %p1340_p8 }
  0x73   : > { %p1342_p2 = pmov %p1340_p8 }
  0x74   : > { %991 = vsyncadd (%p1341_p11), [#allocation6], 4294965248 }
  0x75   : > { %993 = dma.done.wait (%p1342_p2), [#allocation9], 2048   ;;  %p1343_p6 = pmov %p1342_p2 }
  0x76   : > { %v1022_v0 = vmov 0.0   ;;  %vm1023_vm0 = vmmov 0   ;;  %v339_v1 = vld [vmem:[#allocation8 + $0x78] sm:$0xff]  ;;  %v338_v3 = vld [vmem:[#allocation8 + $0x70] sm:$0xff]  ;;  %v337_v5 = vld [vmem:[#allocation8 + $0x68] sm:$0xff]  ;;  %s643_s6 = sshll.u32 %s1076_s22, 7 }
  0x77   : > { %995 = vsyncadd (%p1343_p6), [#allocation9], 4294965248  ;;  %680 = vmatprep.subr.mxu0 %v1022_v0  ;;  %715 = vmatprep.subr.mxu1 %v1022_v0  ;;  %v323_v2 = vld [vmem:[#allocation7 + $0x78] sm:$0xff]  ;;  %v322_v4 = vld [vmem:[#allocation7 + $0x70] sm:$0xff]  ;;  %s305_s28 = scalar_lea.vmem [#allocation10], %s1218_s2  ;;  %s511_s29 = scalar_lea.hbm %s1322_s5, %s643_s6 }
  0x78   : > { %712 = vmatprep.mubr.msk.f32.mxu0 %vm1023_vm0, %v1022_v0  ;;  %747 = vmatprep.mubr.msk.f32.mxu1 %vm1023_vm0, %v1022_v0  ;;  %v321_v6 = vld [vmem:[#allocation7 + $0x68] sm:$0xff]  ;;  %v336_v7 = vld [vmem:[#allocation8 + $0x60] sm:$0xff]  ;;  %v335_v9 = vld [vmem:[#allocation8 + $0x58] sm:$0xff]  ;;  %s513_s30 = sshll.u32 %s305_s28, 4  ;;  %s500_s8 = scalar_lea.sflag [#allocation4], %s1215_s17  ;;  %s514_s30 = int_to_ptr.vmem [resolvable:$true] %s513_s30 }
  0x79   : > { %681 = vmatpush3.msra.mxu0 %v339_v1  ;;  %716 = vmatpush3.msra.mxu1 %v323_v2  ;;  %v320_v8 = vld [vmem:[#allocation7 + $0x60] sm:$0xff]  ;;  %v319_v10 = vld [vmem:[#allocation7 + $0x58] sm:$0xff]  ;;  %v334_v11 = vld [vmem:[#allocation8 + $0x50] sm:$0xff]  ;;  %s938_s10 = scalar_lea.vmem %s514_s30, 128  ;;  %p1344_p7 = scmp.ne.s32.totalorder %s1336_s23, 0 }
  0x7a   : > { %682 = vmatprep.subr.mxu0 %v1022_v0  ;;  %717 = vmatprep.subr.mxu1 %v1022_v0  ;;  %v318_v12 = vld [vmem:[#allocation7 + $0x50] sm:$0xff]  ;;  %v333_v13 = vld [vmem:[#allocation8 + $0x48] sm:$0xff]  ;;  %v332_v15 = vld [vmem:[#allocation8 + $0x40] sm:$0xff]  ;;  %p939_p12 = scmp.ne.s32.totalorder %s514_s30, %s938_s10  ;;  %s1024_s16 = smov [#allocation10]  }
  0x7b   : > { %683 = vmatpush3.msra.mxu0 %v338_v3  ;;  %718 = vmatpush3.msra.mxu1 %v322_v4  ;;  %v317_v14 = vld [vmem:[#allocation7 + $0x48] sm:$0xff]  ;;  %v316_v16 = vld [vmem:[#allocation7 + $0x40] sm:$0xff]  ;;  %v331_v17 = vld [vmem:[#allocation8 + $0x38] sm:$0xff]  ;;  %s942_s9 = sshll.u32 %s1024_s16, 4  ;;  %s943_s9 = int_to_ptr.vmem [resolvable:$false] %s942_s9 }
  0x7c   : > { %684 = vmatprep.subr.mxu0 %v1022_v0  ;;  %719 = vmatprep.subr.mxu1 %v1022_v0  ;;  %v315_v18 = vld [vmem:[#allocation7 + $0x38] sm:$0xff]  ;;  %v330_v19 = vld [vmem:[#allocation8 + $0x30] sm:$0xff]  ;;  %v329_v21 = vld [vmem:[#allocation8 + $0x28] sm:$0xff]  ;;  %p940_p9 = pnand %p939_p12, %p1344_p7  ;;  %s944_s22 = scalar_lea.vmem %s943_s9, 256 }
  0x7d   : > { %685 = vmatpush3.msra.mxu0 %v337_v5  ;;  %720 = vmatpush3.msra.mxu1 %v321_v6  ;;  %v314_v20 = vld [vmem:[#allocation7 + $0x30] sm:$0xff]  ;;  %v313_v22 = vld [vmem:[#allocation7 + $0x28] sm:$0xff]  ;;  %v328_v23 = vld [vmem:[#allocation8 + $0x20] sm:$0xff]  ;;  %p945_p5 = scmp.lt.s32.totalorder %s514_s30, %s943_s9  ;;  %p946_p1 = scmp.lt.s32.totalorder %s944_s22, %s938_s10 }
  0x7e   : > { %686 = vmatprep.subr.mxu0 %v1022_v0  ;;  %721 = vmatprep.subr.mxu1 %v1022_v0  ;;  %v312_v24 = vld [vmem:[#allocation7 + $0x20] sm:$0xff]  ;;  %v327_v25 = vld [vmem:[#allocation8 + $0x18] sm:$0xff]  ;;  %v326_v27 = vld [vmem:[#allocation8 + $0x10] sm:$0xff]  ;;  %p941_p13 = pneg %p940_p9 }
  0x7f   : > { %687 = vmatpush3.msra.mxu0 %v336_v7  ;;  %722 = vmatpush3.msra.mxu1 %v320_v8  ;;  %v311_v26 = vld [vmem:[#allocation7 + $0x18] sm:$0xff]  ;;  %v310_v28 = vld [vmem:[#allocation7 + $0x10] sm:$0xff]  ;;  %v325_v29 = vld [vmem:[#allocation8 + $0x8] sm:$0xff]  ;;  %p947_p3 = por %p946_p1, %p945_p5 }
  0x80   : > { %688 = vmatprep.subr.mxu0 %v1022_v0  ;;  %723 = vmatprep.subr.mxu1 %v1022_v0  ;;  %v309_v30 = vld [vmem:[#allocation7 + $0x8] sm:$0xff]  ;;  %v324_v31 = vld [vmem:[#allocation8] sm:$0xff]  ;;  %v307_v33 = vld [vmem:[%s266_s14] sm:$0xff] }
  0x81   : > { %689 = vmatpush3.msra.mxu0 %v335_v9  ;;  %724 = vmatpush3.msra.mxu1 %v319_v10  ;;  %v308_v32 = vld [vmem:[#allocation7] sm:$0xff]  ;;  %p948_p4 = pnand %p947_p3, %p941_p13 }
  0x82   : > { %690 = vmatprep.subr.mxu0 %v1022_v0  ;;  %725 = vmatprep.subr.mxu1 %v1022_v0  ;;  %v306_v34 = vld [vmem:[%s257_s12] sm:$0xff] }
  0x83   : > { %691 = vmatpush3.msra.mxu0 %v334_v11  ;;  %726 = vmatpush3.msra.mxu1 %v318_v12  ;;  %v640_v37 = vld [vmem:[%s1321_s4] ss:$0 sm:$0xff] }
  0x84   : > { %692 = vmatprep.subr.mxu0 %v1022_v0  ;;  %727 = vmatprep.subr.mxu1 %v1022_v0 }
  0x85   : > { %693 = vmatpush3.msra.mxu0 %v333_v13  ;;  %728 = vmatpush3.msra.mxu1 %v317_v14 }
  0x86   : > { %694 = vmatprep.subr.mxu0 %v1022_v0  ;;  %729 = vmatprep.subr.mxu1 %v1022_v0 }
  0x87   : > { %695 = vmatpush3.msra.mxu0 %v332_v15  ;;  %730 = vmatpush3.msra.mxu1 %v316_v16 }
  0x88   : > { %696 = vmatprep.subr.mxu0 %v1022_v0  ;;  %731 = vmatprep.subr.mxu1 %v1022_v0 }
  0x89   : > { %697 = vmatpush3.msra.mxu0 %v331_v17  ;;  %732 = vmatpush3.msra.mxu1 %v315_v18 }
  0x8a   : > { %698 = vmatprep.subr.mxu0 %v1022_v0  ;;  %733 = vmatprep.subr.mxu1 %v1022_v0 }
  0x8b   : > { %699 = vmatpush3.msra.mxu0 %v330_v19  ;;  %734 = vmatpush3.msra.mxu1 %v314_v20 }
  0x8c   : > { %700 = vmatprep.subr.mxu0 %v1022_v0  ;;  %735 = vmatprep.subr.mxu1 %v1022_v0 }
  0x8d   : > { %701 = vmatpush3.msra.mxu0 %v329_v21  ;;  %736 = vmatpush3.msra.mxu1 %v313_v22 }
  0x8e   : > { %702 = vmatprep.subr.mxu0 %v1022_v0  ;;  %737 = vmatprep.subr.mxu1 %v1022_v0 }
  0x8f   : > { %703 = vmatpush3.msra.mxu0 %v328_v23  ;;  %738 = vmatpush3.msra.mxu1 %v312_v24 }
  0x90   : > { %704 = vmatprep.subr.mxu0 %v1022_v0  ;;  %739 = vmatprep.subr.mxu1 %v1022_v0 }
  0x91   : > { %705 = vmatpush3.msra.mxu0 %v327_v25  ;;  %740 = vmatpush3.msra.mxu1 %v311_v26 }
  0x92   : > { %706 = vmatprep.subr.mxu0 %v1022_v0  ;;  %741 = vmatprep.subr.mxu1 %v1022_v0 }
  0x93   : > { %707 = vmatpush3.msra.mxu0 %v326_v27  ;;  %742 = vmatpush3.msra.mxu1 %v310_v28 }
  0x94   : > { %708 = vmatprep.subr.mxu0 %v1022_v0  ;;  %743 = vmatprep.subr.mxu1 %v1022_v0 }
  0x95   : > { %709 = vmatpush3.msra.mxu0 %v325_v29  ;;  %744 = vmatpush3.msra.mxu1 %v309_v30 }
  0x96   : > { %710 = vmatprep.subr.mxu0 %v1022_v0  ;;  %745 = vmatprep.subr.mxu1 %v1022_v0 }
  0x97   : > { %711 = vmatpush3.msra.mxu0 %v324_v31  ;;  %746 = vmatpush3.msra.mxu1 %v308_v32 }
  0x98   : > { %713 = vmatmul.mubr.f32.vlgmr.msra.gmra.mxu0 %v307_v33  ;;  %748 = vmatmul.mubr.f32.vlgmr.msra.gmra.mxu1 %v306_v34 }
 0x158   : > { %v406_v35 = vpop.f32.mrf.mxu0  ;;  %v476_v36 = vpop.f32.mrf.mxu1 }
 0x159   : > { %v477_v38 = vadd.f32 %v476_v36, %v406_v35 }
 0x15a   : > { %v714_v39 = vpop.f32.mrf.mxu0  ;;  %v749_v40 = vpop.f32.mrf.mxu1 }
 0x15b   : > { %v487_v41 = vadd.f32 %v640_v37, %v477_v38 }
 0x15d   : > { %v641_v42 = vmul.f32 -1.442695, %v487_v41 }
 0x15f   : > { %826 = vpow2.f32 %v641_v42 }
 0x16c   : > { %v827_v43 = vpop.eup %826 }
 0x16d   : > { %v491_v44 = vadd.f32 1.0, %v827_v43 }
 0x16f   : > { %828 = vrcp.f32 %v491_v44 }
 0x17c   : > { %v829_v45 = vpop.eup %828 }
 0x17d   : > { %v495_v46 = vsub.f32 1.0, %v829_v45  ;;  %v494_v47 = vmul.f32 %v829_v45, %v306_v34 }
 0x17f   : > { %v496_v48 = vmul.f32 %v495_v46, %v307_v33 }
 0x181   : > { %v497_v49 = vadd.f32 %v496_v48, %v494_v47 }
 0x183   : > { %498 = vst [vmem:[%s305_s28] sm:$0xff] %v497_v49 }
 0x184   : > { %951 = shalt.err (!%p948_p4)
}
 0x185   : > { %s952_s2 = scalar_lea.hbm %s511_s29, 128  ;;  %s956_s26 = scalar_lea.hbm %s1322_s5, 256 }
 0x186   : > { %p953_p10 = scmp.ne.s32.totalorder %s511_s29, %s952_s2  ;;  %p957_p11 = scmp.lt.s32.totalorder %s511_s29, %s1322_s5 }
 0x187   : > { %p958_p2 = scmp.lt.s32.totalorder %s956_s26, %s952_s2 }
 0x188   : > { %p954_p0 = pnand %p953_p10, %p1344_p7 }
 0x189   : > { %p959_p6 = por %p958_p2, %p957_p11 }
 0x18a   : > { %p955_p8 = pneg %p954_p0 }
 0x18c   : > { %p960_p12 = pnand %p959_p6, %p955_p8 }
 0x18e   : > { %963 = shalt.err (!%p960_p12)
}
 0x18f   : > { %762 = dma.vmem_to_hbm [thread:$0]  (%p1344_p7), %s514_s30, 128, %s511_s29, %s500_s8  }
 0x190 PF: > { %s525_s24 = sand.u32 1, %s1002_s18   ;;  %p1345_p9 = scmp.ne.s32.totalorder %s1330_s25, 0 }
 0x191   : > { %p1346_p13 = scmp.ge.s32.totalorder %s1014_s21, 2  ;;  %s526_s3 = scalar_lea.sflag [#allocation4], %s525_s24 }
 0x193   : > { %p779_p5 = pnand %p1346_p13, %p1345_p9 }
 0x195   : > { %p780_p1 = pneg %p779_p5 }
 0x197   : > { %997 = dma.done.wait (%p780_p1), %s526_s3, 128  }
 0x198   : > { %999 = vsyncadd (%p780_p1), %s526_s3, 4294967168  ;;  %p22_p3 = scmp.ge.s32.totalorder %s1127_s15, 4   ;;  %s1347_s18 = smov %s1006_s19 }
 0x199   : > { %s1348_s19 = smov %s1010_s20  ;;  %s1349_s20 = smov %s1143_s27 }
 0x19a   : > { %s1350_s21 = smov %s1127_s15  ;;  %24 = sbr.rel (!%p22_p3) target bundleno = 11 (0xb), region = 106 }
 0x19f   :  { %531 = vsyncpa [#allocation3], 1 }
 0x1a0   :  { %533 = vsyncpa [#allocation3 + $0x1], 1 }
 0x1a1   :  { %534 = vsyncpa [#allocation6], 1 }
 0x1a2   :  { %536 = vsyncpa [#allocation6 + $0x1], 1 }
 0x1a3   :  { %537 = vsyncpa [#allocation9], 1 }
 0x1a4   :  { %538 = vsyncpa [#allocation4], 1 }
 0x1a5   :  { %540 = vsyncpa [#allocation4 + $0x1], 1 }

</bundles_post_ra>
